<compile_context>
chip_gen: v7x
topology: tpu7x:2x2x1
jax: 0.10.0
libtpu: 0.0.40
codegen_flags: <defaults>
</compile_context>

<pallas_src>
import functools
import math

import jax
import jax.numpy as jnp
from jax.experimental import pallas as pl
from jax.experimental.pallas import tpu as pltpu


def _round_up(v, m):
    return (v + m - 1) // m * m


# -----------------------------------------------------------------------------
# Fused kernel: conv (MXU matmul) -> in-VMEM BN stat finalize -> BN + ReLU.
# -----------------------------------------------------------------------------
def _fused_conv_bn_relu_kernel(p_ref, w_ref, g_ref, b_ref, o_ref, *,
                               n_valid, tile_m, eps):
    """One grid step = one lane-aligned column tile of the (Cout, N*HW) output.

    p_ref: (Kpad, tile_m)        bf16 im2col patches (columns = output pixels)
    w_ref: (Cpad, Kpad)          bf16 reordered conv weight
    g_ref/b_ref: (1, Cpad, 1)    f32 BN gamma / beta
    o_ref: (T, Cpad, tile_m)     f32 output; index_map is constant so the FULL
                                 array stays resident in VMEM across the grid.
    """
    i = pl.program_id(0)

    # Conv for this column tile: a single bf16 MXU matmul, f32 accumulation.
    acc = jnp.dot(w_ref[...], p_ref[...], preferred_element_type=jnp.float32)
    o_ref[i] = acc

    # Last step: the whole conv result is resident in VMEM -> finalize BN
    # batch statistics exactly (two-pass variance) and apply BN+ReLU in place.
    @pl.when(i == pl.num_programs(0) - 1)
    def _finalize():
        conv = o_ref[...]                                  # (T, Cpad, tile_m)
        t, _, l = conv.shape

        mean = jnp.sum(jnp.sum(conv, axis=2, keepdims=True),
                       axis=0, keepdims=True) / n_valid    # (1, Cpad, 1)
        centered = conv - mean
        if t * l > n_valid:   # static: mask zero-padded columns out of var
            t_idx = jax.lax.broadcasted_iota(jnp.int32, conv.shape, 0)
            l_idx = jax.lax.broadcasted_iota(jnp.int32, conv.shape, 2)
            centered = jnp.where(t_idx * tile_m + l_idx < n_valid,
                                 centered, 0.0)
        var = jnp.sum(jnp.sum(centered * centered, axis=2, keepdims=True),
                      axis=0, keepdims=True) / n_valid     # (1, Cpad, 1)

        inv_std = jax.lax.rsqrt(var + eps)
        scale = g_ref[...] * inv_std                       # (1, Cpad, 1)
        shift = b_ref[...] - mean * scale
        o_ref[...] = jnp.maximum(conv * scale + shift, 0.0).astype(o_ref.dtype)


# -----------------------------------------------------------------------------
# Wrapper: NCHW in / NCHW out, PyTorch training-mode BN semantics.
# -----------------------------------------------------------------------------
def conv2d_bn_relu(x_nchw, weight_oihw, gamma, beta, *, stride=1, padding=1,
                   eps=1e-5):
    n, c_in, h, w = x_nchw.shape
    c_out, _, kh, kw = weight_oihw.shape
    h_out = (h + 2 * padding - kh) // stride + 1
    w_out = (w + 2 * padding - kw) // stride + 1
    m = n * h_out * w_out                 # batch folded into the matmul M dim
    k = kh * kw * c_in                    # contraction depth

    k_pad = _round_up(k, 16)              # bf16 sublane multiple
    c_pad = _round_up(c_out, 8)           # f32 sublane multiple
    m_pad = _round_up(m, 128)             # lane multiple
    tile_m = math.gcd(m_pad, 1024)        # largest lane-aligned tile dividing m_pad
    num_tiles = m_pad // tile_m

    # ---- wrapper-side im2col (layout glue; keeps lane shuffles out of the
    # kernel).  patches[(ih*kw+iw)*c_in + ci, n_*Ho*Wo + ho*Wo + wo].
    x_nhwc = jnp.transpose(x_nchw, (0, 2, 3, 1))
    x_p = jnp.pad(x_nhwc, ((0, 0), (padding, padding), (padding, padding),
                           (0, 0)))
    cols = []
    for ih in range(kh):
        for iw in range(kw):
            cols.append(x_p[:, ih:ih + stride * (h_out - 1) + 1:stride,
                               iw:iw + stride * (w_out - 1) + 1:stride, :])
    patches = jnp.stack(cols, axis=0)                  # (KH*KW, N, Ho, Wo, Cin)
    patches = jnp.transpose(patches, (0, 4, 1, 2, 3)).reshape(k, m)
    patches = jnp.pad(patches, ((0, k_pad - k), (0, m_pad - m)))
    patches = patches.astype(jnp.bfloat16)             # MXU-native inputs

    # (Cout, Cin, KH, KW) -> (Cout, KH, KW, Cin) -> (Cpad, Kpad) bf16.
    w2d = jnp.transpose(weight_oihw, (0, 2, 3, 1)).reshape(c_out, k)
    w2d = jnp.pad(w2d, ((0, c_pad - c_out), (0, k_pad - k))).astype(jnp.bfloat16)

    gamma_p = jnp.pad(gamma.astype(jnp.float32),
                      (0, c_pad - c_out)).reshape(1, c_pad, 1)
    beta_p = jnp.pad(beta.astype(jnp.float32),
                     (0, c_pad - c_out)).reshape(1, c_pad, 1)

    kernel = functools.partial(_fused_conv_bn_relu_kernel,
                               n_valid=m, tile_m=tile_m, eps=float(eps))

    # VMEM sizing from the actual block footprint (resident output block +
    # double-buffered patch tiles + weight + gamma/beta), with headroom.
    vmem_need = (num_tiles * c_pad * tile_m * 4
                 + 2 * k_pad * tile_m * 2
                 + 2 * c_pad * k_pad * 2
                 + 4 * c_pad * 4)
    vmem_limit = int(min(96 * 2**20, max(16 * 2**20, 2 * vmem_need)))

    # TODO(synk): when the resident conv block no longer fits VMEM (large
    # N*H*W) fall back to the two-pass kernels (parallel partial-stats pass +
    # parallel BN/ReLU apply pass, bf16 conv_out, input_output_aliases); that
    # split is also the only way to feed v7x's second TensorCore, since this
    # fused kernel is a single sequential ("arbitrary") grid.

    out3d = pl.pallas_call(
        kernel,
        out_shape=jax.ShapeDtypeStruct((num_tiles, c_pad, tile_m), jnp.float32),
        grid=(num_tiles,),
        in_specs=[
            pl.BlockSpec((k_pad, tile_m), lambda i: (0, i)),
            pl.BlockSpec((c_pad, k_pad), lambda i: (0, 0)),
            pl.BlockSpec((1, c_pad, 1), lambda i: (0, 0, 0)),
            pl.BlockSpec((1, c_pad, 1), lambda i: (0, 0, 0)),
        ],
        out_specs=pl.BlockSpec((num_tiles, c_pad, tile_m),
                               lambda i: (0, 0, 0)),
        compiler_params=pltpu.CompilerParams(
            dimension_semantics=("arbitrary",),
            vmem_limit_bytes=vmem_limit),
    )(patches, w2d, gamma_p, beta_p)

    # (T, Cpad, tile_m) -> (Cout, N*Ho*Wo) -> NCHW.
    out2d = jnp.transpose(out3d, (1, 0, 2)).reshape(c_pad, m_pad)[:c_out, :m]
    return jnp.transpose(out2d.reshape(c_out, n, h_out, w_out), (1, 0, 2, 3))


# -----------------------------------------------------------------------------
# Deterministic parameter init (mirrors Conv_2D.init_weights)
# -----------------------------------------------------------------------------
def init_params(key, in_channels, out_channels, kernel_size):
    k_w, k_g = jax.random.split(key)
    fan_in = in_channels * kernel_size * kernel_size
    fan_out = out_channels * kernel_size * kernel_size
    bound = (6.0 / (fan_in + fan_out)) ** 0.5               # xavier_uniform_
    weight = jax.random.uniform(
        k_w, (out_channels, in_channels, kernel_size, kernel_size),
        minval=-bound, maxval=bound, dtype=jnp.float32)
    gamma = 1.0 + 0.02 * jax.random.normal(k_g, (out_channels,),
                                           dtype=jnp.float32)
    beta = jnp.zeros((out_channels,), dtype=jnp.float32)
    return weight, gamma, beta


def _reference(x, weight, gamma, beta, stride, padding, eps=1e-5):
    y = jax.lax.conv_general_dilated(
        x, weight, window_strides=(stride, stride),
        padding=[(padding, padding), (padding, padding)],
        dimension_numbers=("NCHW", "OIHW", "NCHW"),
        precision=jax.lax.Precision.HIGHEST)
    mean = jnp.mean(y, axis=(0, 2, 3), keepdims=True)
    var = jnp.mean((y - mean) ** 2, axis=(0, 2, 3), keepdims=True)
    y = (y - mean) * jax.lax.rsqrt(var + eps)
    y = y * gamma.reshape(1, -1, 1, 1) + beta.reshape(1, -1, 1, 1)
    return jnp.maximum(y, 0.0)


if __name__ == "__main__":
    key = jax.random.PRNGKey(0)
    k_x, k_p = jax.random.split(key)

    # Small shapes consistent with the module: N=2, Cin=4, H=W=16, Cout=8, k=3.
    N, C_IN, H, W = 2, 4, 16, 16
    C_OUT, K, STRIDE, PAD = 8, 3, 1, 1

    x = jax.random.normal(k_x, (N, C_IN, H, W), dtype=jnp.float32)
    weight, gamma, beta = init_params(k_p, C_IN, C_OUT, K)

    out = conv2d_bn_relu(x, weight, gamma, beta, stride=STRIDE, padding=PAD)
    out = jax.block_until_ready(out)
    assert out.shape == (N, C_OUT, H, W)

    # Tight check vs a precision-matched reference: conv inputs rounded to
    # bf16 (exactly what the MXU consumes), f32 accumulation / f32 BN stats.
    x_bf = x.astype(jnp.bfloat16).astype(jnp.float32)
    w_bf = weight.astype(jnp.bfloat16).astype(jnp.float32)
    ref_bf = _reference(x_bf, w_bf, gamma, beta, STRIDE, PAD)
    assert jnp.allclose(out, ref_bf, atol=1e-4, rtol=1e-4), \
        "mismatch vs precision-matched reference"

    # Sanity check vs the pure-f32 reference (difference bounded by bf16
    # rounding of the matmul inputs only).
    ref = _reference(x, weight, gamma, beta, STRIDE, PAD)
    assert float(jnp.max(jnp.abs(out - ref))) < 5e-2, "mismatch vs f32 reference"

    print("KERNEL_OK")
</pallas_src>

<mosaic_0001>
module attributes {stable_mosaic.version = 11 : i64} {
  func.func @_fused_conv_bn_relu_kernel(%arg0: i32, %arg1: memref<48x512xbf16, #tpu.memory_space<vmem>>, %arg2: memref<8x48xbf16, #tpu.memory_space<vmem>>, %arg3: memref<1x8x1xf32, #tpu.memory_space<vmem>>, %arg4: memref<1x8x1xf32, #tpu.memory_space<vmem>>, %arg5: memref<1x8x512xf32, #tpu.memory_space<vmem>>) attributes {dimension_semantics = [#tpu.dimension_semantics<arbitrary>], iteration_bounds = array<i64: 1>, scalar_prefetch = 0 : i64, scratch_operands = 0 : i64, tpu.core_type = #tpu.core_type<tc>, window_params = [{transform_indices = @transform_0, window_bounds = array<i64: 48, 512>}, {pipeline_mode = #tpu.pipeline_mode<synchronous>, transform_indices = @transform_1, window_bounds = array<i64: 8, 48>}, {pipeline_mode = #tpu.pipeline_mode<synchronous>, transform_indices = @transform_2, window_bounds = array<i64: 1, 8, 1>}, {pipeline_mode = #tpu.pipeline_mode<synchronous>, transform_indices = @transform_3, window_bounds = array<i64: 1, 8, 1>}, {pipeline_mode = #tpu.pipeline_mode<synchronous>, transform_indices = @transform_4, window_bounds = array<i64: 1, 8, 512>}]} {
    %c0 = arith.constant 0 : index
    %c0_0 = arith.constant 0 : index
    %0 = vector.load %arg2[%c0, %c0_0] : memref<8x48xbf16, #tpu.memory_space<vmem>>, vector<8x48xbf16>
    %c0_1 = arith.constant 0 : index
    %c0_2 = arith.constant 0 : index
    %1 = vector.load %arg1[%c0_1, %c0_2] : memref<48x512xbf16, #tpu.memory_space<vmem>>, vector<48x512xbf16>
    %cst = arith.constant dense<0.000000e+00> : vector<8x512xf32>
    %2 = tpu.matmul %0, %1, %cst {dimension_numbers = #tpu.dot_dimension_numbers<[1], [0], [0], [1], [0, 0, 1, 1], [], []>} : vector<8x48xbf16>, vector<48x512xbf16>, vector<8x512xf32> -> vector<8x512xf32>
    %3 = arith.index_cast %arg0 : i32 to index
    %c0_3 = arith.constant 0 : index
    %c0_4 = arith.constant 0 : index
    %4 = vector.load %arg5[%3, %c0_3, %c0_4] : memref<1x8x512xf32, #tpu.memory_space<vmem>>, vector<1x8x512xf32>
    %5 = vector.shape_cast %4 : vector<1x8x512xf32> to vector<8x512xf32>
    %6 = vector.shape_cast %2 : vector<8x512xf32> to vector<1x8x512xf32>
    tpu.vector_store %arg5[%3, %c0_3, %c0_4], %6 {strides = array<i32>} : memref<1x8x512xf32, #tpu.memory_space<vmem>>, vector<1x8x512xf32>,
    %c0_i32 = arith.constant 0 : i32
    %7 = arith.cmpi eq, %arg0, %c0_i32 : i32
    %8 = arith.extui %7 : i1 to i32
    %c0_i32_5 = arith.constant 0 : i32
    %9 = arith.cmpi ne, %8, %c0_i32_5 : i32
    scf.if %9 {
      %c0_6 = arith.constant 0 : index
      %c0_7 = arith.constant 0 : index
      %c0_8 = arith.constant 0 : index
      %10 = vector.load %arg5[%c0_6, %c0_7, %c0_8] : memref<1x8x512xf32, #tpu.memory_space<vmem>>, vector<1x8x512xf32>
      %cst_9 = arith.constant dense<0.000000e+00> : vector<1x8xf32>
      %11 = vector.multi_reduction <add>, %10, %cst_9 [2] : vector<1x8x512xf32> to vector<1x8xf32>
      %12 = vector.shape_cast %11 : vector<1x8xf32> to vector<1x8x1xf32>
      %cst_10 = arith.constant dense<0.000000e+00> : vector<8x1xf32>
      %13 = vector.multi_reduction <add>, %12, %cst_10 [0] : vector<1x8x1xf32> to vector<8x1xf32>
      %14 = vector.shape_cast %13 : vector<8x1xf32> to vector<1x8x1xf32>
      %cst_11 = arith.constant 5.120000e+02 : f32
      %15 = vector.broadcast %cst_11 : f32 to vector<1x8x1xf32>
      %16 = arith.divf %14, %15 : vector<1x8x1xf32>
      %17 = vector.broadcast %16 : vector<1x8x1xf32> to vector<1x8x512xf32>
      %18 = arith.subf %10, %17 : vector<1x8x512xf32>
      %19 = arith.mulf %18, %18 : vector<1x8x512xf32>
      %cst_12 = arith.constant dense<0.000000e+00> : vector<1x8xf32>
      %20 = vector.multi_reduction <add>, %19, %cst_12 [2] : vector<1x8x512xf32> to vector<1x8xf32>
      %21 = vector.shape_cast %20 : vector<1x8xf32> to vector<1x8x1xf32>
      %cst_13 = arith.constant dense<0.000000e+00> : vector<8x1xf32>
      %22 = vector.multi_reduction <add>, %21, %cst_13 [0] : vector<1x8x1xf32> to vector<8x1xf32>
      %23 = vector.shape_cast %22 : vector<8x1xf32> to vector<1x8x1xf32>
      %cst_14 = arith.constant 5.120000e+02 : f32
      %24 = vector.broadcast %cst_14 : f32 to vector<1x8x1xf32>
      %25 = arith.divf %23, %24 : vector<1x8x1xf32>
      %cst_15 = arith.constant 9.99999974E-6 : f32
      %26 = vector.broadcast %cst_15 : f32 to vector<1x8x1xf32>
      %27 = arith.addf %25, %26 : vector<1x8x1xf32>
      %28 = math.rsqrt %27 : vector<1x8x1xf32>
      %c0_16 = arith.constant 0 : index
      %c0_17 = arith.constant 0 : index
      %c0_18 = arith.constant 0 : index
      %29 = vector.load %arg3[%c0_16, %c0_17, %c0_18] : memref<1x8x1xf32, #tpu.memory_space<vmem>>, vector<1x8x1xf32>
      %30 = arith.mulf %29, %28 : vector<1x8x1xf32>
      %c0_19 = arith.constant 0 : index
      %c0_20 = arith.constant 0 : index
      %c0_21 = arith.constant 0 : index
      %31 = vector.load %arg4[%c0_19, %c0_20, %c0_21] : memref<1x8x1xf32, #tpu.memory_space<vmem>>, vector<1x8x1xf32>
      %32 = arith.mulf %16, %30 : vector<1x8x1xf32>
      %33 = arith.subf %31, %32 : vector<1x8x1xf32>
      %34 = vector.broadcast %30 : vector<1x8x1xf32> to vector<1x8x512xf32>
      %35 = arith.mulf %10, %34 : vector<1x8x512xf32>
      %36 = vector.broadcast %33 : vector<1x8x1xf32> to vector<1x8x512xf32>
      %37 = arith.addf %35, %36 : vector<1x8x512xf32>
      %cst_22 = arith.constant 0.000000e+00 : f32
      %38 = vector.broadcast %cst_22 : f32 to vector<1x8x512xf32>
      %39 = arith.maximumf %37, %38 : vector<1x8x512xf32>
      %c0_23 = arith.constant 0 : index
      %c0_24 = arith.constant 0 : index
      %c0_25 = arith.constant 0 : index
      %40 = vector.load %arg5[%c0_23, %c0_24, %c0_25] : memref<1x8x512xf32, #tpu.memory_space<vmem>>, vector<1x8x512xf32>
      tpu.vector_store %arg5[%c0_23, %c0_24, %c0_25], %39 {strides = array<i32>} : memref<1x8x512xf32, #tpu.memory_space<vmem>>, vector<1x8x512xf32>,
    } else {
    }
    return
  }
  func.func @transform_0(%arg0: i32) -> (i32, i32) {
    %c0_i32 = arith.constant 0 : i32
    %c0_i32_0 = arith.constant 0 : i32
    return %c0_i32, %arg0 : i32, i32
  }
  func.func @transform_1(%arg0: i32) -> (i32, i32) {
    %c0_i32 = arith.constant 0 : i32
    %c0_i32_0 = arith.constant 0 : i32
    %c0_i32_1 = arith.constant 0 : i32
    return %c0_i32, %c0_i32_0 : i32, i32
  }
  func.func @transform_2(%arg0: i32) -> (i32, i32, i32) {
    %c0_i32 = arith.constant 0 : i32
    %c0_i32_0 = arith.constant 0 : i32
    %c0_i32_1 = arith.constant 0 : i32
    %c0_i32_2 = arith.constant 0 : i32
    return %c0_i32, %c0_i32_0, %c0_i32_1 : i32, i32, i32
  }
  func.func @transform_3(%arg0: i32) -> (i32, i32, i32) {
    %c0_i32 = arith.constant 0 : i32
    %c0_i32_0 = arith.constant 0 : i32
    %c0_i32_1 = arith.constant 0 : i32
    %c0_i32_2 = arith.constant 0 : i32
    return %c0_i32, %c0_i32_0, %c0_i32_1 : i32, i32, i32
  }
  func.func @transform_4(%arg0: i32) -> (i32, i32, i32) {
    %c0_i32 = arith.constant 0 : i32
    %c0_i32_0 = arith.constant 0 : i32
    %c0_i32_1 = arith.constant 0 : i32
    %c0_i32_2 = arith.constant 0 : i32
    return %c0_i32, %c0_i32_0, %c0_i32_1 : i32, i32, i32
  }
}

</mosaic_0001>

<bundles_post_ra>
// kernel: tpu_custom_call.1
= control target key start
LH: loop header
LB: loop body
LE: loop exit
PB: predicated region body
PF: predicated region fallthrough
CT: control target
= control target key end

     0   :  { %9 = vsyncpa [#allocation3], 0  ;;  %s430_s0 = inlined_call_operand.hbm [shape: bf16[48,512], index: 0, kind: input, shape index: {}]   ;;  %s431_s1 = inlined_call_operand.vmem [shape: bf16[8,48], index: 1, kind: input, shape index: {}]   ;;  %s432_s2 = inlined_call_operand.vmem [shape: f32[1,8,1], index: 2, kind: input, shape index: {}]   ;;  %s433_s3 = inlined_call_operand.vmem [shape: f32[1,8,1], index: 3, kind: input, shape index: {}]   ;;  %s434_s4 = inlined_call_operand.hbm [shape: f32[1,8,512], index: 4, kind: output, shape index: {}]  }
   0x1   :  { %10 = vsyncpa [#allocation4], 0  ;;  %s367_s15 = smov [#allocation2]   ;;  %s319_s19 = scalar_lea.hbm %s430_s0, 1536 }
   0x2   :  { %s16_s16 = sshll.u32 %s367_s15, 4  ;;  %p320_p0 = scmp.ne.s32.totalorder %s430_s0, %s319_s19  ;;  %s17_s16 = int_to_ptr.vmem [resolvable:$true] %s16_s16 }
   0x3   :  { %p323_p1 = scmp.lt.u32.totalorder %s319_s19, %s430_s0 }
   0x5   :  { %p325_p2 = pnand %p323_p1, %p320_p0 }
   0x7   :  { %328 = shalt.err (!%p325_p2)
}
   0x8   :  { %s329_s24 = scalar_lea.vmem %s17_s16, 1536  ;;  %p334_p4 = scmp.lt.s32.totalorder %s17_s16, %s17_s16 }
   0x9   :  { %p330_p3 = scmp.ne.s32.totalorder %s17_s16, %s329_s24  ;;  %p335_p5 = scmp.lt.s32.totalorder %s329_s24, %s329_s24 }
   0xb   :  { %p336_p6 = por %p335_p5, %p334_p4 }
   0xd   :  { %p337_p7 = pnand %p336_p6, %p330_p3 }
   0xf   :  { %340 = shalt.err (!%p337_p7)
}
  0x10   :  { %s368_s25 = smov 256   ;;  %s369_s26 = smov 16  }
  0x11   :  { %22 = dma.hbm_to_vmem [thread:$0]  %s430_s0, 1536, %s17_s16, [#allocation3], %s368_s25, %s368_s25, %s369_s26  }
  0x12   :  { %363 = dma.done.wait [#allocation3], 1536  }
  0x13   :  { %364 = vsyncadd [#allocation3], 4294965760  ;;  %v370_v0 = vmov 0   ;;  %v299_v1 = vld [vmem:[#allocation2 + $0x4] ss:$16 sps:$4 sm:$0xff]   ;;  %vm106_vm0 = vcmask 392192  }
  0x14   :  { %142 = vmatprep.mubr.bf16.mxu0 %v370_v0  ;;  %183 = vmatprep.mubr.bf16.mxu1 %v370_v0  ;;  %v301_v2 = vld [vmem:[#allocation2 + $0xc] ss:$16 sps:$4 sm:$0xff]   ;;  %v303_v3 = vld [vmem:[#allocation2] ss:$16 sps:$4 sm:$0xff]   ;;  %v304_v4 = vld [vmem:[#allocation2 + $0x8] ss:$16 sps:$4 sm:$0xff]  }
  0x15   :  { %297 = vset.pattern.permute.xlu1 %v370_v0  ;;  %298 = vset.pattern.permute.xlu0 %v370_v0  ;;  %v305_v5 = vld [vmem:[#allocation2 + $0x24] ss:$16 sps:$4 sm:$0xff]   ;;  %v307_v6 = vld [vmem:[#allocation2 + $0x2c] ss:$16 sps:$4 sm:$0xff]   ;;  %v309_v7 = vld [vmem:[#allocation2 + $0x20] ss:$16 sps:$4 sm:$0xff]  }
  0x16   :  { %110 = vmatprep.subr.bf16.mxu0 %v299_v1  ;;  %151 = vmatprep.subr.bf16.mxu1 %v301_v2  ;;  %v310_v8 = vld [vmem:[#allocation2 + $0x28] ss:$16 sps:$4 sm:$0xff]   ;;  %v311_v9 = vld [vmem:[#allocation2 + $0x44] ss:$16 sps:$4 sm:$0xff]   ;;  %v313_v10 = vld [vmem:[#allocation2 + $0x4c] ss:$16 sps:$4 sm:$0xff]  }
  0x17   :  { %111 = vmatpush1.bf16.msra.mxu0 %v303_v3  ;;  %152 = vmatpush1.bf16.msra.mxu1 %v304_v4  ;;  %v315_v11 = vld [vmem:[#allocation2 + $0x40] ss:$16 sps:$4 sm:$0xff]   ;;  %v316_v12 = vld [vmem:[#allocation2 + $0x48] ss:$16 sps:$4 sm:$0xff]   ;;  %s371_s7 = smov [#allocation5]  }
  0x18   :  { %112 = vmatprep.subr.bf16.mxu0 %v305_v5  ;;  %153 = vmatprep.subr.bf16.mxu1 %v307_v6  ;;  %v33_v13 = vld [vmem:[%s431_s1] sm:$0xf]  ;;  %s269_s8 = sshll.u32 %s371_s7, 4  ;;  %s270_s8 = int_to_ptr.vmem [resolvable:$true] %s269_s8 }
  0x19   :  { %v232_v41 = vld [vmem:[%s432_s2] sm:$0xff]  ;;  %s341_s2 = scalar_lea.vmem %s270_s8, 512  ;;  %p346_p9 = scmp.lt.s32.totalorder %s270_s8, %s270_s8 }
  0x1a   :  { %v234_v44 = vld [vmem:[%s433_s3] sm:$0xff]  ;;  %p342_p8 = scmp.ne.s32.totalorder %s270_s8, %s341_s2  ;;  %p347_p10 = scmp.lt.s32.totalorder %s341_s2, %s341_s2 }
  0x1b   :  { %113 = vmatpush1.bf16.msra.mxu0 %v309_v7  ;;  %154 = vmatpush1.bf16.msra.mxu1 %v310_v8 }
  0x1c   :  { %114 = vmatprep.subr.bf16.mxu0 %v311_v9  ;;  %155 = vmatprep.subr.bf16.mxu1 %v313_v10  ;;  %p348_p11 = por %p347_p10, %p346_p9 }
  0x1e   :  { %p349_p12 = pnand %p348_p11, %p342_p8 }
  0x1f   :  { %115 = vmatpush1.bf16.msra.mxu0 %v315_v11  ;;  %156 = vmatpush1.bf16.msra.mxu1 %v316_v12 }
  0x22   :  { %290 = vmatmul.mubr.msk.bf16.vlgmr.msra.gmra.mrb[0].mxu0 %vm106_vm0, %v33_v13  ;;  %291 = vmatmul.mubr.msk.bf16.vlgmr.msra.gmra.mrb[0].mxu1 %vm106_vm0, %v33_v13 }
  0xf5   :  { %v144_v14 = vpop.f32.mrb[0].mxu0  ;;  %v185_v15 = vpop.f32.mrb[0].mxu1 }
  0xf6   :  { %v146_v16 = vpop.f32.mrb[1].mxu0  ;;  %v187_v17 = vpop.f32.mrb[1].mxu1 }
  0xf7   :  { %v148_v18 = vpop.f32.mrb[2].mxu0  ;;  %v189_v19 = vpop.f32.mrb[2].mxu1  ;;  %v207_v20 = vadd.f32 %v146_v16, %v144_v14 }
  0xf8   :  { %v149_v21 = vpop.f32.mrb[3].mxu0  ;;  %v190_v22 = vpop.f32.mrb[3].mxu1 }
  0xf9   :  { %v208_v23 = vadd.f32 %v207_v20, %v185_v15 }
  0xfb   :  { %v209_v24 = vadd.f32 %v208_v23, %v187_v17 }
  0xfd   :  { %210 = vadd.xlane.f32.xlu0 %v209_v24 }
 0x18a   :  { %v211_v25 = vpop.xlane.xlu0 %210 }
 0x18b   :  { %v214_v26 = vmul.f32 0.001953125, %v211_v25 }
 0x18d   :  { %v215_v27 = vsub.f32 %v144_v14, %v214_v26  ;;  %v216_v28 = vsub.f32 %v146_v16, %v214_v26  ;;  %v217_v29 = vsub.f32 %v185_v15, %v214_v26  ;;  %v218_v30 = vsub.f32 %v187_v17, %v214_v26 }
 0x18f   :  { %v219_v31 = vmul.f32 %v215_v27, %v215_v27  ;;  %v220_v32 = vmul.f32 %v216_v28, %v216_v28  ;;  %v221_v33 = vmul.f32 %v217_v29, %v217_v29  ;;  %v222_v35 = vmul.f32 %v218_v30, %v218_v30 }
 0x191   :  { %v223_v34 = vadd.f32 %v220_v32, %v219_v31 }
 0x193   :  { %v224_v36 = vadd.f32 %v223_v34, %v221_v33 }
 0x195   :  { %v225_v37 = vadd.f32 %v224_v36, %v222_v35 }
 0x197   :  { %226 = vadd.xlane.f32.xlu0 %v225_v37 }
 0x224   :  { %v227_v38 = vpop.xlane.xlu0 %226 }
 0x225   :  { %v229_v39 = vmul.f32 0.001953125, %v227_v38 }
 0x227   :  { %v230_v40 = vadd.f32 1e-05, %v229_v39 }
 0x229   :  { %317 = vrsqrt.f32 %v230_v40 }
 0x233   :  { %v318_v42 = vpop.eup %317 }
 0x234   :  { %v233_v43 = vmul.f32 %v318_v42, %v232_v41 }
 0x236   :  { %239 = vperm.xlu1 %297, %v233_v43   ;;  %v235_v45 = vmul.f32 %v233_v43, %v214_v26 }
 0x238   :  { %v236_v46 = vsub.f32 %v234_v44, %v235_v45 }
 0x23a   :  { %248 = vperm.xlu1 %297, %v236_v46  }
 0x2b5   :  { %v240_v47 = vpop.permute.xlu1 %239 }
 0x2b6   :  { %v242_v48 = vmul.f32 %v240_v47, %v144_v14  ;;  %v243_v49 = vmul.f32 %v240_v47, %v146_v16  ;;  %v244_v50 = vmul.f32 %v240_v47, %v185_v15  ;;  %v245_v51 = vmul.f32 %v240_v47, %v187_v17 }
 0x2b9   :  { %v249_v52 = vpop.permute.xlu1 %248 }
 0x2ba   :  { %v251_v53 = vadd.f32 %v249_v52, %v242_v48  ;;  %v252_v54 = vadd.f32 %v249_v52, %v243_v49  ;;  %v253_v55 = vadd.f32 %v249_v52, %v244_v50  ;;  %v254_v56 = vadd.f32 %v249_v52, %v245_v51 }
 0x2bc   :  { %v255_v57 = vmax.f32 %v251_v53, 0.0  ;;  %v256_v58 = vmax.f32 %v252_v54, 0.0  ;;  %v257_v59 = vmax.f32 %v253_v55, 0.0  ;;  %v258_v60 = vmax.f32 %v254_v56, 0.0 }
 0x2be   :  { %259 = vst [vmem:[#allocation5] sm:$0xff] %v255_v57  ;;  %260 = vst [vmem:[#allocation5 + $0x8] sm:$0xff] %v256_v58 }
 0x2bf   :  { %261 = vst [vmem:[#allocation5 + $0x10] sm:$0xff] %v257_v59  ;;  %262 = vst [vmem:[#allocation5 + $0x18] sm:$0xff] %v258_v60 }
 0x2c0   :  { %352 = shalt.err (!%p349_p12)
}
 0x2c1   :  { %s353_s10 = scalar_lea.hbm %s434_s4, 512 }
 0x2c2   :  { %p354_p13 = scmp.ne.s32.totalorder %s434_s4, %s353_s10  ;;  %p357_p0 = scmp.lt.u32.totalorder %s353_s10, %s434_s4 }
 0x2c4   :  { %p359_p1 = pnand %p357_p0, %p354_p13 }
 0x2c6   :  { %362 = shalt.err (!%p359_p1)
}
 0x2c7   :  { %272 = dma.vmem_to_hbm [thread:$0]  %s270_s8, 512, %s434_s4, [#allocation4]  }
 0x2c8   :  { %365 = dma.done.wait [#allocation4], 512  }
 0x2c9   :  { %366 = vsyncadd [#allocation4], 4294966784 }
 0x2ca   :  { %276 = vsyncpa [#allocation3], 1 }
 0x2cb   :  { %277 = vsyncpa [#allocation4], 1 }

</bundles_post_ra>
